<compile_context>
chip_gen: v7x
topology: tpu7x:2x2x1
jax: 0.10.0
libtpu: 0.0.40
codegen_flags: <defaults>
</compile_context>

<pallas_src>
import functools

import jax
import jax.numpy as jnp
from jax.experimental import pallas as pl
from jax.experimental.pallas import tpu as pltpu


def _ghost_bn_kernel(x_ref, w_ref, b_ref, o_ref,
                     sum_ref, sq_ref, scale_ref, shift_ref,
                     *, eps, inv_count):
    """Grid = (chunk, c_tile, pass, b_tile); pass 0 = stats, pass 1 = normalize.

    x_ref/o_ref : (tb, tc, S) block (batch-in-chunk tile, channel tile, spatial).
    w_ref/b_ref : (1, tc, 1) per-channel affine params (f32).
    scratch     : (1, tc, 1) f32 accumulators / folded scale+shift.
    """
    p = pl.program_id(2)
    t = pl.program_id(3)
    nt = pl.num_programs(3)

    @pl.when(p == 0)
    def _stats_pass():
        @pl.when(t == 0)
        def _init():
            sum_ref[...] = jnp.zeros_like(sum_ref)
            sq_ref[...] = jnp.zeros_like(sq_ref)

        x = x_ref[...].astype(jnp.float32)                   # (tb, tc, S)
        s1 = jnp.sum(x, axis=2, keepdims=True)               # lane reduce (XLU)
        s2 = jnp.sum(x * x, axis=2, keepdims=True)
        sum_ref[...] += jnp.sum(s1, axis=0, keepdims=True)   # (1, tc, 1)
        sq_ref[...] += jnp.sum(s2, axis=0, keepdims=True)

        @pl.when(t == nt - 1)
        def _finalize():
            # One-pass stats: var = E[x^2] - mean^2 (f32 accumulation, clamped).
            mean = sum_ref[...] * inv_count
            var = jnp.maximum(sq_ref[...] * inv_count - mean * mean, 0.0)
            inv_std = jax.lax.rsqrt(var + eps)
            scale = inv_std * w_ref[...]
            scale_ref[...] = scale
            shift_ref[...] = b_ref[...] - mean * scale

    @pl.when(p == 1)
    def _normalize_pass():
        x = x_ref[...].astype(jnp.float32)
        o_ref[...] = (x * scale_ref[...] + shift_ref[...]).astype(o_ref.dtype)


def _vmem_plan():
    """Generation-aware VMEM sizing: (scoped vmem_limit_bytes, block budget).

    vmem_limit = 3/4 of physical VMEM (96 MiB on v5e/v6e's 128 MiB, 48 MiB on
    v7x's 64 MiB).  Block budget accounts for double-buffered input AND output
    blocks of the same size plus scratch/param slack:
        block_budget <= (vmem_limit - slack) / 4.
    """
    try:
        cap = int(getattr(pltpu.get_tpu_info(), "vmem_capacity_bytes",
                          128 * 1024 * 1024))
    except Exception:
        cap = 128 * 1024 * 1024
    vmem_limit = (cap * 3) // 4
    slack = 2 * 1024 * 1024          # tiny f32 scratch + weight/bias blocks + headroom
    block_budget = max((vmem_limit - slack) // 4, 64 * 1024)
    return vmem_limit, block_budget


def _chip_has_multiple_tensorcores():
    """True where 'parallel' grid axes shard across >1 TensorCore
    (v4/v5p megacore, v7x dual-TC).  Heuristic on device_kind; safe fallback."""
    try:
        kind = jax.devices()[0].device_kind.lower()
    except Exception:
        return False
    if "lite" in kind or "v5e" in kind or "v6e" in kind:
        return False
    return any(tag in kind for tag in ("v4", "v5", "7"))


def _choose_tiles(B, C, S, itemsize, budget_bytes, min_c_tiles):
    """Pick (tb, tc).

    Prefer tb == B (whole ghost chunk resident per channel tile => single HBM
    read of x across both passes) by shrinking tc first.  Only fall back to
    batch tiling (tb < B) when even the smallest legal channel tile does not
    fit the budget.
    """
    if C % 8 == 0:
        c_cands = [d for d in range(C, 0, -8) if C % d == 0]   # descending, layout-legal
    else:
        c_cands = [C]   # full-dim block satisfies the (8,128) rule for any C

    # Path 1: whole chunk resident per channel tile (single-read fast path).
    per_chan_chunk_bytes = B * S * itemsize
    resident = [tc for tc in c_cands if tc * per_chan_chunk_bytes <= budget_bytes]
    if resident:
        tc = resident[0]                         # largest resident channel tile
        if min_c_tiles > 1:
            # Keep both TensorCores busy: largest resident tc with >= min_c_tiles tiles.
            for cand in resident:
                if C // cand >= min_c_tiles:
                    tc = cand
                    break
        return B, tc

    # Path 2 (fallback): smallest legal channel tile, then stream batch tiles.
    tc = c_cands[-1]
    per_batch_row = tc * S * itemsize
    max_tb = max(1, budget_bytes // per_batch_row)
    tb = 1
    for d in range(min(B, max_tb), 0, -1):
        if B % d == 0:
            tb = d
            break
    return tb, tc


def sequential_ghost_norm(x, weight, bias, *, virtual_batch_size=64, eps=1e-5,
                          block_budget_bytes=None):
    """x: (N, C, H, W) NCHW (matching the PyTorch module). Returns (N, C, H, W)."""
    N, C, H, W = x.shape
    num_chunks = max(N // virtual_batch_size, 1)
    # TODO(synk): unequal torch.chunk sizes (N % num_chunks != 0) not supported.
    assert N % num_chunks == 0, "equal-size chunks assumed"
    B = N // num_chunks          # batch per ghost chunk
    S = H * W                    # spatial elements (lane axis)

    # Free, contiguous reshapes — no HBM transposes.
    x_r = x.reshape(num_chunks, B, C, S)
    w_r = weight.reshape(1, C, 1).astype(jnp.float32)
    b_r = bias.reshape(1, C, 1).astype(jnp.float32)

    vmem_limit, derived_budget = _vmem_plan()
    budget = derived_budget if block_budget_bytes is None else min(
        int(block_budget_bytes), derived_budget)

    itemsize = jnp.dtype(x.dtype).itemsize       # blocks live in VMEM in x's dtype
    min_c_tiles = 2 if (_chip_has_multiple_tensorcores() and num_chunks == 1) else 1
    tb, tc = _choose_tiles(B, C, S, itemsize, budget, min_c_tiles)
    c_tiles = C // tc
    b_tiles = B // tb
    inv_count = 1.0 / float(B * S)

    block_bytes = tb * tc * S * itemsize
    # Deeper input pipeline only for small streaming blocks (fallback path);
    # large blocks keep the default double buffer.
    if b_tiles > 1 and block_bytes < (1 << 20):
        x_spec = pl.BlockSpec((None, tb, tc, S), lambda g, c, p, t: (g, t, c, 0),
                              pipeline_mode=pl.Buffered(3))
    else:
        x_spec = pl.BlockSpec((None, tb, tc, S), lambda g, c, p, t: (g, t, c, 0))

    kernel = functools.partial(_ghost_bn_kernel, eps=float(eps),
                               inv_count=inv_count)

    grid = (num_chunks, c_tiles, 2, b_tiles)     # (chunk, c-tile, pass, b-tile)

    out_r = pl.pallas_call(
        kernel,
        out_shape=jax.ShapeDtypeStruct((num_chunks, B, C, S), x.dtype),
        grid_spec=pltpu.PrefetchScalarGridSpec(
            num_scalar_prefetch=0,
            grid=grid,
            in_specs=[
                # x: one (tb, tc, S) tile of chunk g (resident across passes
                # when b_tiles == 1, since the block index is pass-invariant).
                x_spec,
                # weight / bias: resident per-channel-tile constants.
                pl.BlockSpec((1, tc, 1), lambda g, c, p, t: (0, c, 0)),
                pl.BlockSpec((1, tc, 1), lambda g, c, p, t: (0, c, 0)),
            ],
            # Pin the output block during pass 0 (p==0 -> index 0) so each
            # output block is written back exactly once, in pass 1.
            out_specs=pl.BlockSpec((None, tb, tc, S),
                                   lambda g, c, p, t: (g, t * p, c, 0)),
            scratch_shapes=[
                pltpu.VMEM((1, tc, 1), jnp.float32),  # running sum
                pltpu.VMEM((1, tc, 1), jnp.float32),  # running sum of squares
                pltpu.VMEM((1, tc, 1), jnp.float32),  # folded scale
                pltpu.VMEM((1, tc, 1), jnp.float32),  # folded shift
            ],
        ),
        compiler_params=pltpu.CompilerParams(
            dimension_semantics=("parallel", "parallel", "arbitrary", "arbitrary"),
            vmem_limit_bytes=int(vmem_limit),
        ),
    )(x_r, w_r, b_r)

    return out_r.reshape(N, C, H, W)


def _reference(x, weight, bias, *, virtual_batch_size, eps):
    N = x.shape[0]
    num_chunks = max(N // virtual_batch_size, 1)
    chunks = jnp.split(x, num_chunks, axis=0)
    outs = []
    for c in chunks:
        cf = c.astype(jnp.float32)
        mean = jnp.mean(cf, axis=(0, 2, 3), keepdims=True)
        var = jnp.mean((cf - mean) ** 2, axis=(0, 2, 3), keepdims=True)
        y = (cf - mean) / jnp.sqrt(var + eps)
        y = y * weight.reshape(1, -1, 1, 1) + bias.reshape(1, -1, 1, 1)
        outs.append(y.astype(x.dtype))
    return jnp.concatenate(outs, axis=0)


if __name__ == "__main__":
    key = jax.random.PRNGKey(0)
    eps = 1e-5

    configs = [
        # 2 ghost chunks, whole chunk block-resident (single-HBM-read path).
        dict(N=8, C=8, H=16, W=16, vbs=4, budget=None, dtype=jnp.float32,
             rand_affine=False, tol=1e-4),
        # Tiny forced budget -> channel tiling (tc=8) + batch streaming (tb=1):
        # exercises the two-pass accumulate/normalize fallback and Buffered(3).
        dict(N=8, C=16, H=8, W=8, vbs=4, budget=2 * 1024, dtype=jnp.float32,
             rand_affine=True, tol=1e-4),
        # num_chunks == 1 (N < virtual_batch_size), C not a multiple of 8.
        dict(N=2, C=4, H=16, W=16, vbs=64, budget=None, dtype=jnp.float32,
             rand_affine=False, tol=1e-4),
        # bf16 input: dtype-aware block budgeting; f32 compute inside kernel.
        dict(N=8, C=8, H=8, W=16, vbs=4, budget=None, dtype=jnp.bfloat16,
             rand_affine=True, tol=5e-2),
    ]

    for i, cfg in enumerate(configs):
        key, kx, kw, kb = jax.random.split(key, 4)
        x = jax.random.normal(kx, (cfg["N"], cfg["C"], cfg["H"], cfg["W"]),
                              dtype=jnp.float32).astype(cfg["dtype"])
        if cfg["rand_affine"]:
            weight = 1.0 + 0.5 * jax.random.normal(kw, (cfg["C"],), jnp.float32)
            bias = 0.1 * jax.random.normal(kb, (cfg["C"],), jnp.float32)
        else:
            # reset_parameters(): weight = 1, bias = 0
            weight = jnp.ones((cfg["C"],), jnp.float32)
            bias = jnp.zeros((cfg["C"],), jnp.float32)

        out = sequential_ghost_norm(x, weight, bias,
                                    virtual_batch_size=cfg["vbs"], eps=eps,
                                    block_budget_bytes=cfg["budget"])
        out = jax.block_until_ready(out)

        ref = _reference(x, weight, bias, virtual_batch_size=cfg["vbs"], eps=eps)
        assert out.shape == x.shape and out.dtype == x.dtype
        assert jnp.allclose(out.astype(jnp.float32), ref.astype(jnp.float32),
                            atol=cfg["tol"], rtol=cfg["tol"]), f"mismatch cfg {i}"

    print("KERNEL_OK")
</pallas_src>

<mosaic_0001>
module attributes {stable_mosaic.version = 11 : i64} {
  func.func @_ghost_bn_kernel(%arg0: i32, %arg1: i32, %arg2: i32, %arg3: i32, %arg4: memref<1x4x8x256xf32, #tpu.memory_space<vmem>>, %arg5: memref<1x8x1xf32, #tpu.memory_space<vmem>>, %arg6: memref<1x8x1xf32, #tpu.memory_space<vmem>>, %arg7: memref<1x4x8x256xf32, #tpu.memory_space<vmem>>, %arg8: memref<1x8x1xf32, #tpu.memory_space<vmem>>, %arg9: memref<1x8x1xf32, #tpu.memory_space<vmem>>, %arg10: memref<1x8x1xf32, #tpu.memory_space<vmem>>, %arg11: memref<1x8x1xf32, #tpu.memory_space<vmem>>) attributes {dimension_semantics = [#tpu.dimension_semantics<parallel>, #tpu.dimension_semantics<parallel>, #tpu.dimension_semantics<arbitrary>, #tpu.dimension_semantics<arbitrary>], iteration_bounds = array<i64: 2, 1, 2, 1>, scalar_prefetch = 0 : i64, scratch_operands = 4 : i64, tpu.core_type = #tpu.core_type<tc>, window_params = [{transform_indices = @transform_0, window_bounds = array<i64: 1, 4, 8, 256>}, {transform_indices = @transform_1, window_bounds = array<i64: 1, 8, 1>}, {transform_indices = @transform_2, window_bounds = array<i64: 1, 8, 1>}, {transform_indices = @transform_3, window_bounds = array<i64: 1, 4, 8, 256>}]} {
    %c0_i32 = arith.constant 0 : i32
    %0 = arith.cmpi eq, %arg2, %c0_i32 : i32
    %1 = arith.extui %0 : i1 to i32
    %c0_i32_0 = arith.constant 0 : i32
    %2 = arith.cmpi ne, %1, %c0_i32_0 : i32
    scf.if %2 {
      %c0_i32_2 = arith.constant 0 : i32
      %6 = arith.cmpi eq, %arg3, %c0_i32_2 : i32
      %7 = arith.extui %6 : i1 to i32
      %c0_i32_3 = arith.constant 0 : i32
      %8 = arith.cmpi ne, %7, %c0_i32_3 : i32
      scf.if %8 {
        %cst_24 = arith.constant 0.000000e+00 : f32
        %29 = vector.broadcast %cst_24 : f32 to vector<1x8x1xf32>
        %c0_25 = arith.constant 0 : index
        %c0_26 = arith.constant 0 : index
        %c0_27 = arith.constant 0 : index
        %30 = vector.load %arg8[%c0_25, %c0_26, %c0_27] : memref<1x8x1xf32, #tpu.memory_space<vmem>>, vector<1x8x1xf32>
        tpu.vector_store %arg8[%c0_25, %c0_26, %c0_27], %29 {strides = array<i32>} : memref<1x8x1xf32, #tpu.memory_space<vmem>>, vector<1x8x1xf32>,
        %cst_28 = arith.constant 0.000000e+00 : f32
        %31 = vector.broadcast %cst_28 : f32 to vector<1x8x1xf32>
        %c0_29 = arith.constant 0 : index
        %c0_30 = arith.constant 0 : index
        %c0_31 = arith.constant 0 : index
        %32 = vector.load %arg9[%c0_29, %c0_30, %c0_31] : memref<1x8x1xf32, #tpu.memory_space<vmem>>, vector<1x8x1xf32>
        tpu.vector_store %arg9[%c0_29, %c0_30, %c0_31], %31 {strides = array<i32>} : memref<1x8x1xf32, #tpu.memory_space<vmem>>, vector<1x8x1xf32>,
      } else {
      }
      %c0 = arith.constant 0 : index
      %c0_4 = arith.constant 0 : index
      %c0_5 = arith.constant 0 : index
      %c0_6 = arith.constant 0 : index
      %9 = vector.load %arg4[%c0, %c0_4, %c0_5, %c0_6] : memref<1x4x8x256xf32, #tpu.memory_space<vmem>>, vector<1x4x8x256xf32>
      %10 = vector.shape_cast %9 : vector<1x4x8x256xf32> to vector<4x8x256xf32>
      %cst = arith.constant dense<0.000000e+00> : vector<4x8xf32>
      %11 = vector.multi_reduction <add>, %10, %cst [2] : vector<4x8x256xf32> to vector<4x8xf32>
      %12 = vector.shape_cast %11 : vector<4x8xf32> to vector<4x8x1xf32>
      %13 = arith.mulf %10, %10 : vector<4x8x256xf32>
      %cst_7 = arith.constant dense<0.000000e+00> : vector<4x8xf32>
      %14 = vector.multi_reduction <add>, %13, %cst_7 [2] : vector<4x8x256xf32> to vector<4x8xf32>
      %15 = vector.shape_cast %14 : vector<4x8xf32> to vector<4x8x1xf32>
      %c0_8 = arith.constant 0 : index
      %c0_9 = arith.constant 0 : index
      %c0_10 = arith.constant 0 : index
      %16 = vector.load %arg8[%c0_8, %c0_9, %c0_10] : memref<1x8x1xf32, #tpu.memory_space<vmem>>, vector<1x8x1xf32>
      %cst_11 = arith.constant dense<0.000000e+00> : vector<8x1xf32>
      %17 = vector.multi_reduction <add>, %12, %cst_11 [0] : vector<4x8x1xf32> to vector<8x1xf32>
      %18 = vector.shape_cast %17 : vector<8x1xf32> to vector<1x8x1xf32>
      %19 = arith.addf %16, %18 : vector<1x8x1xf32>
      %c0_12 = arith.constant 0 : index
      %c0_13 = arith.constant 0 : index
      %c0_14 = arith.constant 0 : index
      %20 = vector.load %arg8[%c0_12, %c0_13, %c0_14] : memref<1x8x1xf32, #tpu.memory_space<vmem>>, vector<1x8x1xf32>
      tpu.vector_store %arg8[%c0_12, %c0_13, %c0_14], %19 {strides = array<i32>} : memref<1x8x1xf32, #tpu.memory_space<vmem>>, vector<1x8x1xf32>,
      %c0_15 = arith.constant 0 : index
      %c0_16 = arith.constant 0 : index
      %c0_17 = arith.constant 0 : index
      %21 = vector.load %arg9[%c0_15, %c0_16, %c0_17] : memref<1x8x1xf32, #tpu.memory_space<vmem>>, vector<1x8x1xf32>
      %cst_18 = arith.constant dense<0.000000e+00> : vector<8x1xf32>
      %22 = vector.multi_reduction <add>, %15, %cst_18 [0] : vector<4x8x1xf32> to vector<8x1xf32>
      %23 = vector.shape_cast %22 : vector<8x1xf32> to vector<1x8x1xf32>
      %24 = arith.addf %21, %23 : vector<1x8x1xf32>
      %c0_19 = arith.constant 0 : index
      %c0_20 = arith.constant 0 : index
      %c0_21 = arith.constant 0 : index
      %25 = vector.load %arg9[%c0_19, %c0_20, %c0_21] : memref<1x8x1xf32, #tpu.memory_space<vmem>>, vector<1x8x1xf32>
      tpu.vector_store %arg9[%c0_19, %c0_20, %c0_21], %24 {strides = array<i32>} : memref<1x8x1xf32, #tpu.memory_space<vmem>>, vector<1x8x1xf32>,
      %c0_i32_22 = arith.constant 0 : i32
      %26 = arith.cmpi eq, %arg3, %c0_i32_22 : i32
      %27 = arith.extui %26 : i1 to i32
      %c0_i32_23 = arith.constant 0 : i32
      %28 = arith.cmpi ne, %27, %c0_i32_23 : i32
      scf.if %28 {
        %c0_24 = arith.constant 0 : index
        %c0_25 = arith.constant 0 : index
        %c0_26 = arith.constant 0 : index
        %29 = vector.load %arg8[%c0_24, %c0_25, %c0_26] : memref<1x8x1xf32, #tpu.memory_space<vmem>>, vector<1x8x1xf32>
        %cst_27 = arith.constant 9.765625E-4 : f32
        %30 = vector.broadcast %cst_27 : f32 to vector<1x8x1xf32>
        %31 = arith.mulf %29, %30 : vector<1x8x1xf32>
        %c0_28 = arith.constant 0 : index
        %c0_29 = arith.constant 0 : index
        %c0_30 = arith.constant 0 : index
        %32 = vector.load %arg9[%c0_28, %c0_29, %c0_30] : memref<1x8x1xf32, #tpu.memory_space<vmem>>, vector<1x8x1xf32>
        %cst_31 = arith.constant 9.765625E-4 : f32
        %33 = vector.broadcast %cst_31 : f32 to vector<1x8x1xf32>
        %34 = arith.mulf %32, %33 : vector<1x8x1xf32>
        %35 = arith.mulf %31, %31 : vector<1x8x1xf32>
        %36 = arith.subf %34, %35 : vector<1x8x1xf32>
        %cst_32 = arith.constant 0.000000e+00 : f32
        %37 = vector.broadcast %cst_32 : f32 to vector<1x8x1xf32>
        %38 = arith.maximumf %36, %37 : vector<1x8x1xf32>
        %cst_33 = arith.constant 9.99999974E-6 : f32
        %39 = vector.broadcast %cst_33 : f32 to vector<1x8x1xf32>
        %40 = arith.addf %38, %39 : vector<1x8x1xf32>
        %41 = math.rsqrt %40 : vector<1x8x1xf32>
        %c0_34 = arith.constant 0 : index
        %c0_35 = arith.constant 0 : index
        %c0_36 = arith.constant 0 : index
        %42 = vector.load %arg5[%c0_34, %c0_35, %c0_36] : memref<1x8x1xf32, #tpu.memory_space<vmem>>, vector<1x8x1xf32>
        %43 = arith.mulf %41, %42 : vector<1x8x1xf32>
        %c0_37 = arith.constant 0 : index
        %c0_38 = arith.constant 0 : index
        %c0_39 = arith.constant 0 : index
        %44 = vector.load %arg10[%c0_37, %c0_38, %c0_39] : memref<1x8x1xf32, #tpu.memory_space<vmem>>, vector<1x8x1xf32>
        tpu.vector_store %arg10[%c0_37, %c0_38, %c0_39], %43 {strides = array<i32>} : memref<1x8x1xf32, #tpu.memory_space<vmem>>, vector<1x8x1xf32>,
        %c0_40 = arith.constant 0 : index
        %c0_41 = arith.constant 0 : index
        %c0_42 = arith.constant 0 : index
        %45 = vector.load %arg6[%c0_40, %c0_41, %c0_42] : memref<1x8x1xf32, #tpu.memory_space<vmem>>, vector<1x8x1xf32>
        %46 = arith.mulf %31, %43 : vector<1x8x1xf32>
        %47 = arith.subf %45, %46 : vector<1x8x1xf32>
        %c0_43 = arith.constant 0 : index
        %c0_44 = arith.constant 0 : index
        %c0_45 = arith.constant 0 : index
        %48 = vector.load %arg11[%c0_43, %c0_44, %c0_45] : memref<1x8x1xf32, #tpu.memory_space<vmem>>, vector<1x8x1xf32>
        tpu.vector_store %arg11[%c0_43, %c0_44, %c0_45], %47 {strides = array<i32>} : memref<1x8x1xf32, #tpu.memory_space<vmem>>, vector<1x8x1xf32>,
      } else {
      }
    } else {
    }
    %c1_i32 = arith.constant 1 : i32
    %3 = arith.cmpi eq, %arg2, %c1_i32 : i32
    %4 = arith.extui %3 : i1 to i32
    %c0_i32_1 = arith.constant 0 : i32
    %5 = arith.cmpi ne, %4, %c0_i32_1 : i32
    scf.if %5 {
      %c0 = arith.constant 0 : index
      %c0_2 = arith.constant 0 : index
      %c0_3 = arith.constant 0 : index
      %c0_4 = arith.constant 0 : index
      %6 = vector.load %arg4[%c0, %c0_2, %c0_3, %c0_4] : memref<1x4x8x256xf32, #tpu.memory_space<vmem>>, vector<1x4x8x256xf32>
      %7 = vector.shape_cast %6 : vector<1x4x8x256xf32> to vector<4x8x256xf32>
      %c0_5 = arith.constant 0 : index
      %c0_6 = arith.constant 0 : index
      %c0_7 = arith.constant 0 : index
      %8 = vector.load %arg10[%c0_5, %c0_6, %c0_7] : memref<1x8x1xf32, #tpu.memory_space<vmem>>, vector<1x8x1xf32>
      %9 = vector.broadcast %8 : vector<1x8x1xf32> to vector<4x8x256xf32>
      %10 = arith.mulf %7, %9 : vector<4x8x256xf32>
      %c0_8 = arith.constant 0 : index
      %c0_9 = arith.constant 0 : index
      %c0_10 = arith.constant 0 : index
      %11 = vector.load %arg11[%c0_8, %c0_9, %c0_10] : memref<1x8x1xf32, #tpu.memory_space<vmem>>, vector<1x8x1xf32>
      %12 = vector.broadcast %11 : vector<1x8x1xf32> to vector<4x8x256xf32>
      %13 = arith.addf %10, %12 : vector<4x8x256xf32>
      %c0_11 = arith.constant 0 : index
      %c0_12 = arith.constant 0 : index
      %c0_13 = arith.constant 0 : index
      %c0_14 = arith.constant 0 : index
      %14 = vector.load %arg7[%c0_11, %c0_12, %c0_13, %c0_14] : memref<1x4x8x256xf32, #tpu.memory_space<vmem>>, vector<1x4x8x256xf32>
      %15 = vector.shape_cast %14 : vector<1x4x8x256xf32> to vector<4x8x256xf32>
      %16 = vector.shape_cast %13 : vector<4x8x256xf32> to vector<1x4x8x256xf32>
      tpu.vector_store %arg7[%c0_11, %c0_12, %c0_13, %c0_14], %16 {strides = array<i32>} : memref<1x4x8x256xf32, #tpu.memory_space<vmem>>, vector<1x4x8x256xf32>,
    } else {
    }
    return
  }
  func.func @transform_0(%arg0: i32, %arg1: i32, %arg2: i32, %arg3: i32) -> (i32, i32, i32, i32) {
    %c0_i32 = arith.constant 0 : i32
    %c0_i32_0 = arith.constant 0 : i32
    return %arg0, %arg3, %arg1, %c0_i32 : i32, i32, i32, i32
  }
  func.func @transform_1(%arg0: i32, %arg1: i32, %arg2: i32, %arg3: i32) -> (i32, i32, i32) {
    %c0_i32 = arith.constant 0 : i32
    %c0_i32_0 = arith.constant 0 : i32
    %c0_i32_1 = arith.constant 0 : i32
    return %c0_i32, %arg1, %c0_i32_0 : i32, i32, i32
  }
  func.func @transform_2(%arg0: i32, %arg1: i32, %arg2: i32, %arg3: i32) -> (i32, i32, i32) {
    %c0_i32 = arith.constant 0 : i32
    %c0_i32_0 = arith.constant 0 : i32
    %c0_i32_1 = arith.constant 0 : i32
    return %c0_i32, %arg1, %c0_i32_0 : i32, i32, i32
  }
  func.func @transform_3(%arg0: i32, %arg1: i32, %arg2: i32, %arg3: i32) -> (i32, i32, i32, i32) {
    %0 = arith.muli %arg3, %arg2 : i32
    %c0_i32 = arith.constant 0 : i32
    %c0_i32_0 = arith.constant 0 : i32
    return %arg0, %0, %arg1, %c0_i32 : i32, i32, i32, i32
  }
}

</mosaic_0001>

<bundles_post_ra>
// kernel: tpu_custom_call.1
= control target key start
LH: loop header
LB: loop body
LE: loop exit
PB: predicated region body
PF: predicated region fallthrough
CT: control target
= control target key end

     0   :  { %s1206_s0 = inlined_call_operand.hbm [shape: f32[2,4,8,256], index: 0, kind: input, shape index: {}]   ;;  %s1207_s1 = inlined_call_operand.hbm [shape: f32[1,8,1], index: 1, kind: input, shape index: {}]   ;;  %s1208_s2 = inlined_call_operand.hbm [shape: f32[1,8,1], index: 2, kind: input, shape index: {}]   ;;  %s1209_s3 = inlined_call_operand.hbm [shape: f32[2,4,8,256], index: 3, kind: output, shape index: {}]  }
   0x1   :  { %1216 = sst [smem:[#allocation16_spill]] %s1207_s1 }
   0x2   :  { %8 = vsyncpa [#allocation7], 0 }
   0x3   :  { %10 = vsyncpa [#allocation7 + $0x1], 0 }
   0x4   :  { %11 = vsyncpa [#allocation10], 0 }
   0x5   :  { %12 = vsyncpa [#allocation8], 0 }
   0x6   :  { %14 = vsyncpa [#allocation8 + $0x1], 0  ;;  %s897_s12 = smov 0   ;;  %s899_s13 = smov 0  }
   0x7   :  { %s901_s14 = smov 0   ;;  %s903_s15 = smov 0  }
   0x8   :  { %s905_s16 = smov 0   ;;  %s907_s17 = smov 0  }
   0x9   :  { %s909_s18 = smov 0   ;;  %s911_s19 = smov 0  }
   0xa LB: > { %s546_s20 = sadd.s32 4294967295, %s865_s19   ;;  %s547_s21 = sadd.s32 4294967294, %s865_s19   ;;  %s865_s19 = sphi %s911_s19, %s20_s19   ;;  %s861_s18 = sphi %s909_s18, %s1240_s18   ;;  %s857_s17 = sphi %s907_s17, %s1239_s17   ;;  %s853_s16 = sphi %s905_s16, %s1238_s16   ;;  %s849_s15 = sphi %s903_s15, %s1237_s15   ;;  %s845_s14 = sphi %s901_s14, %s1236_s14   ;;  %s841_s13 = sphi %s899_s13, %s1235_s13   ;;  %s837_s12 = sphi %s897_s12, %s1234_s12  }
   0xb   : > { %p64_p0 = scmp.ne.s32.totalorder %s845_s14, %s841_s13  ;;  %p65_p1 = scmp.eq.s32.totalorder %s865_s19, 0 }
   0xc   : > { %p70_p2 = scmp.ne.s32.totalorder %s841_s13, %s837_s12  ;;  %p944_p3 = scmp.eq.s32.totalorder %s546_s20, 0 }
   0xd   : > { %p152_p4 = scmp.eq.s32.totalorder %s546_s20, 3  ;;  %p948_p5 = por %p65_p1, %p64_p0 }
   0xe   : > { %s1217_s22 = scalar_select %p944_p3, 1, 0 }
   0xf   : > { %p158_p6 = scmp.eq.s32.totalorder %s547_s21, 3  ;;  %p954_p7 = por %p944_p3, %p70_p2 }
  0x10   : > { %p958_p8 = por %p152_p4, %p64_p0  ;;  %p548_p10 = scmp.ge.s32.totalorder %s865_s19, 1 }
  0x11   : > { %s1219_s24 = scalar_select %p954_p7, 1, 0 }
  0x12   : > { %s1220_s25 = scalar_select %p958_p8, 1, 0 }
  0x13   : > { %p962_p9 = por %p158_p6, %p70_p2  ;;  %p165_p11 = scmp.lt.s32.totalorder %s865_s19, 5 }
  0x14   : > { %s867_s28 = smov [#allocation9]   ;;  %p598_p13 = scmp.lt.s32.totalorder %s865_s19, 4 }
  0x15   : > { %s1221_s26 = scalar_select %p962_p9, 1, 0 }
  0x16   : > { %p968_p12 = pnand %p548_p10, %p165_p11  ;;  %s180_s29 = sshll.u32 %s867_s28, 4  ;;  %s181_s29 = int_to_ptr.vmem [resolvable:$true] %s180_s29 }
  0x17   : > { %p977_p1 = pnand %p598_p13, %p948_p5  ;;  %s868_s4 = smov [#allocation11]  }
  0x18   : > { %s1222_s27 = scalar_select %p968_p12, 1, 0 }
  0x19   : > { %p581_p0 = pneg %p968_p12  ;;  %s193_s5 = sshll.u32 %s868_s4, 4  ;;  %s987_s5 = int_to_ptr.vmem [resolvable:$true] %s193_s5 }
  0x1a   : > { %s1223_s30 = scalar_select %p977_p1, 1, 0 }
  0x1b   : > { %p983_p2 = pnand %p581_p0, %p944_p3  ;;  %s1225_s1 = sld [smem:[#allocation16_spill]] }
  0x1d   : > { %p679_p5 = pneg %p983_p2 }
  0x21   : > { %s677_s9 = scalar_lea.hbm %s1225_s1, 128 }
  0x22   : > { %p678_p4 = scmp.ne.s32.totalorder %s1225_s1, %s677_s9  ;;  %p684_p11 = scmp.lt.u32.totalorder %s677_s9, %s1225_s1 }
  0x24   : > { %p680_p6 = pnand %p679_p5, %p678_p4 }
  0x26   : > { %p681_p10 = pneg %p680_p6 }
  0x28   : > { %p686_p13 = pnand %p684_p11, %p681_p10 }
  0x2a   : > { %689 = shalt.err (!%p686_p13)
}
  0x2b   : > { %s690_s23 = scalar_lea.vmem %s181_s29, 128  ;;  %p698_p3 = scmp.lt.s32.totalorder %s181_s29, %s181_s29 }
  0x2c   : > { %p691_p0 = scmp.ne.s32.totalorder %s181_s29, %s690_s23  ;;  %p699_p7 = scmp.lt.s32.totalorder %s690_s23, %s690_s23 }
  0x2e   : > { %p693_p9 = pnand %p691_p0, %p679_p5  ;;  %p700_p12 = por %p699_p7, %p698_p3 }
  0x30   : > { %p694_p8 = pneg %p693_p9 }
  0x32   : > { %p701_p1 = pnand %p700_p12, %p694_p8 }
  0x34   : > { %704 = shalt.err (!%p701_p1)
}
  0x35   : > { %584 = dma.hbm_to_vmem [thread:$0]  (!%p983_p2), %s1225_s1, 128, %s181_s29, [#allocation10]  }
  0x36   : > { %s705_s9 = scalar_lea.hbm %s1208_s2, 128 }
  0x37   : > { %p706_p9 = scmp.ne.s32.totalorder %s1208_s2, %s705_s9  ;;  %p712_p8 = scmp.lt.u32.totalorder %s705_s9, %s1208_s2 }
  0x39   : > { %p708_p3 = pnand %p706_p9, %p679_p5 }
  0x3b   : > { %p709_p7 = pneg %p708_p3 }
  0x3d   : > { %p714_p12 = pnand %p712_p8, %p709_p7 }
  0x3f   : > { %717 = shalt.err (!%p714_p12)
}
  0x40   : > { %s718_s29 = scalar_lea.vmem %s987_s5, 128  ;;  %p726_p10 = scmp.lt.s32.totalorder %s987_s5, %s987_s5 }
  0x41   : > { %p719_p1 = scmp.ne.s32.totalorder %s987_s5, %s718_s29  ;;  %p727_p11 = scmp.lt.s32.totalorder %s718_s29, %s718_s29 }
  0x43   : > { %p721_p4 = pnand %p719_p1, %p679_p5  ;;  %p728_p13 = por %p727_p11, %p726_p10 }
  0x45   : > { %p722_p6 = pneg %p721_p4 }
  0x47   : > { %p729_p0 = pnand %p728_p13, %p722_p6 }
  0x49   : > { %732 = shalt.err (!%p729_p0)
}
  0x4a   : > { %587 = dma.hbm_to_vmem [thread:$0]  (!%p983_p2), %s1208_s2, 128, %s987_s5, [#allocation10]  }
  0x4b   : > { %s38_s4 = sadd.s32 1, %s857_s17  ;;  %s46_s7 = sadd.s32 1, %s861_s18 }
  0x4c   : > { %p40_p5 = scmp.ge.s32.totalorder %s38_s4, 2  ;;  %s204_s8 = sand.u32 1, %s845_s14  }
  0x4d   : > { %s552_s9 = sshll.u32 %s204_s8, 6  ;;  %s567_s6 = sshll.u32 %s861_s18, 10 }
  0x4e   : > { %s1242_s4 = smov (%p40_p5, %s38_s4), 0  ;;  %s1244_s7 = smov (!%p40_p5, %s46_s7), %s861_s18 }
  0x4f   : > { %p48_p9 = scmp.ge.s32.totalorder %s1244_s7, 2  ;;  %s1046_s20 = scalar_lea.hbm %s1206_s0, %s567_s6 }
  0x50   : > { %s208_s5 = scalar_lea.vmem [#allocation6], %s552_s9  ;;  %s1059_s10 = scalar_lea.sflag [#allocation7], %s204_s8 }
  0x51   : > { %s220_s21 = sshll.u32 %s208_s5, 4  ;;  %s1246_s7 = smov (%p48_p9, %s1244_s7), 0  ;;  %s1050_s21 = int_to_ptr.vmem [resolvable:$true] %s220_s21 }
  0x52   : > { %s50_s23 = ssub.s32 %s861_s18, %s1246_s7  ;;  %s733_s6 = scalar_lea.hbm %s1046_s20, 1024 }
  0x53   : > { %p1055_p2 = scmp.eq.s32.totalorder %s50_s23, 0  ;;  %p734_p3 = scmp.ne.s32.totalorder %s1046_s20, %s733_s6 }
  0x54   : > { %p1227_p7 = scmp.ne.s32.totalorder %s1223_s30, 0  ;;  %s738_s5 = scalar_lea.hbm %s1206_s0, 2048 }
  0x55   : > { %p739_p4 = scmp.lt.u32.totalorder %s1046_s20, %s1206_s0  ;;  %p740_p6 = scmp.lt.u32.totalorder %s738_s5, %s733_s6 }
  0x56   : > { %p735_p8 = pneg %p1227_p7  ;;  %p742_p11 = scmp.lt.u32.totalorder %s733_s6, %s1046_s20 }
  0x57   : > { %p741_p10 = por %p740_p6, %p739_p4 }
  0x58   : > { %p736_p12 = pnand %p735_p8, %p734_p3 }
  0x59   : > { %p743_p13 = por %p742_p11, %p741_p10 }
  0x5a   : > { %p737_p1 = pneg %p736_p12 }
  0x5c   : > { %p744_p0 = pnand %p743_p13, %p737_p1 }
  0x5e   : > { %747 = shalt.err (!%p744_p0)
}
  0x5f   : > { %s748_s8 = scalar_lea.vmem %s1050_s21, 1024  ;;  %s869_s23 = smov [#allocation6]  }
  0x60   : > { %p749_p5 = scmp.ne.s32.totalorder %s1050_s21, %s748_s8  ;;  %s753_s9 = sshll.u32 %s869_s23, 4  ;;  %s754_s9 = int_to_ptr.vmem [resolvable:$false] %s753_s9 }
  0x61   : > { %s755_s1 = scalar_lea.vmem %s754_s9, 2048  ;;  %p756_p12 = scmp.lt.s32.totalorder %s1050_s21, %s754_s9 }
  0x62   : > { %p751_p9 = pnand %p749_p5, %p735_p8  ;;  %p757_p4 = scmp.lt.s32.totalorder %s755_s1, %s748_s8 }
  0x64   : > { %p752_p3 = pneg %p751_p9  ;;  %p758_p6 = por %p757_p4, %p756_p12 }
  0x66   : > { %p759_p10 = pnand %p758_p6, %p752_p3 }
  0x68   : > { %762 = shalt.err (!%p759_p10)
}
  0x69   : > { %s870_s29 = smov 256   ;;  %s871_s6 = smov 16  }
  0x6a   : > { %591 = dma.hbm_to_vmem [thread:$0]  (!%p1227_p7), %s1046_s20, 1024, %s1050_s21, %s1059_s10, %s870_s29, %s870_s29, %s871_s6  }
  0x6b   : > { %s1228_s11 = sadd.s32 1, %s845_s14  ;;  %p1229_p8 = scmp.ne.s32.totalorder %s1222_s27, 0 }
  0x6c   : > { %s1092_s5 = scalar_select %p1055_p2, %s845_s14, %s1228_s11  }
  0x6d   : > { %232 = sbr.rel (%p1229_p8) target bundleno = 486 (0x1e6), region = 32  ;;  %s1097_s8 = sand.u32 (!%p1229_p8), 1, %s841_s13  }
  0x6e   : > { %s556_s23 = sshll.u32 (!%p1229_p8), %s1097_s8, 6  ;;  %s235_s9 = scalar_lea.sflag (!%p1229_p8), [#allocation7], %s1097_s8 }
  0x6f   : > { %s1101_s1 = scalar_lea.vmem (!%p1229_p8), [#allocation6], %s556_s23  ;;  %p1230_p1 = scmp.ne.s32.totalorder (!%p1229_p8), %s1219_s24, 0 }
  0x74   : > { %824 = dma.done.wait (%p1230_p1), %s235_s9, 1024  }
  0x75   : > { %826 = vsyncadd (%p1230_p1), %s235_s9, 4294966272  ;;  %p1231_p2 = scmp.ne.s32.totalorder %s1217_s22, 0 }
  0x77   : > { %828 = dma.done.wait (%p1231_p2), [#allocation10], 256  }
  0x78   : > { %830 = vsyncadd (%p1231_p2), [#allocation10], 4294967040  ;;  %s1111_s27 = scalar_lea.vmem [#allocation12], %s556_s23  ;;  %p560_p7 = scmp.ne.s32.totalorder %s849_s15, 0 }
  0x79   : > { %v287_v0 = vld [vmem:[%s1101_s1 + $0x20] sm:$0xff] (!%p560_p7)  ;;  %v288_v1 = vld [vmem:[%s1101_s1 + $0x28] sm:$0xff] (!%p560_p7)  ;;  %v285_v6 = vld [vmem:[%s1101_s1 + $0x10] sm:$0xff] (!%p560_p7)  ;;  %vm280_vm0 = vcmask (!%p560_p7), 7168   ;;  %v872_v24 = vmov (!%p560_p7), 0.0  }
  0x7a   : > { %275 = sbr.rel (%p560_p7) target bundleno = 319 (0x13f), region = 48  ;;  %v283_v2 = vld [vmem:[%s1101_s1] sm:$0xff] (!%p560_p7)  ;;  %v297_v3 = vadd.f32 (!%p560_p7), %v288_v1, %v287_v0  ;;  %v284_v4 = vld [vmem:[%s1101_s1 + $0x8] sm:$0xff] (!%p560_p7)  ;;  %v286_v7 = vld [vmem:[%s1101_s1 + $0x18] sm:$0xff] (!%p560_p7)  ;;  %v305_v14 = vmul.f32 (!%p560_p7), %v285_v6, %v285_v6  ;;  %v307_v19 = vmul.f32 (!%p560_p7), %v287_v0, %v287_v0  ;;  %v308_v20 = vmul.f32 (!%p560_p7), %v288_v1, %v288_v1  ;;  %281 = vst.msk [vmem:[#allocation2] sm:$0xff] (!%p560_p7), %vm280_vm0, %v872_v24 }
  0x7b   : > { %v303_v5 = vmul.f32 (!%p560_p7), %v283_v2, %v283_v2  ;;  %v291_v8 = vadd.f32 (!%p560_p7), %v284_v4, %v283_v2  ;;  %v304_v9 = vmul.f32 (!%p560_p7), %v284_v4, %v284_v4  ;;  %v294_v11 = vadd.f32 (!%p560_p7), %v286_v7, %v285_v6  ;;  %v289_v12 = vld [vmem:[%s1101_s1 + $0x30] sm:$0xff] (!%p560_p7)  ;;  %v290_v13 = vld [vmem:[%s1101_s1 + $0x38] sm:$0xff] (!%p560_p7)  ;;  %282 = vst.msk [vmem:[#allocation3] sm:$0xff] (!%p560_p7), %vm280_vm0, %v872_v24  ;;  %v348_v51 = vld [vmem:[#allocation9] sm:$0xff] (!%p560_p7) }
  0x7c   : > { %298 = vadd.xlane.f32.xlu1 (!%p560_p7), %v297_v3  ;;  %v306_v15 = vmul.f32 (!%p560_p7), %v286_v7, %v286_v7  ;;  %v300_v16 = vadd.f32 (!%p560_p7), %v290_v13, %v289_v12  ;;  %v309_v17 = vmul.f32 (!%p560_p7), %v289_v12, %v289_v12  ;;  %v310_v18 = vmul.f32 (!%p560_p7), %v290_v13, %v290_v13  ;;  %v351_v54 = vld [vmem:[#allocation11] sm:$0xff] (!%p560_p7) }
  0x7d   : > { %292 = vadd.xlane.f32.xlu0 (!%p560_p7), %v291_v8  ;;  %v311_v10 = vadd.f32 (!%p560_p7), %v304_v9, %v303_v5  ;;  %v317_v23 = vadd.f32 (!%p560_p7), %v308_v20, %v307_v19 }
  0x7e   : > { %v314_v21 = vadd.f32 (!%p560_p7), %v306_v15, %v305_v14  ;;  %v320_v22 = vadd.f32 (!%p560_p7), %v310_v18, %v309_v17 }
  0x80   : > { %312 = vadd.xlane.f32.xlu1 (!%p560_p7), %v311_v10 }
  0x81   : > { %295 = vadd.xlane.f32.xlu0 %v294_v11  ;;  %v323_v32 = vld [vmem:[#allocation2] sm:$0xff] }
  0x82   : > { %v330_v40 = vld [vmem:[#allocation3] sm:$0xff] }
  0x84   : > { %301 = vadd.xlane.f32.xlu1 %v300_v16 }
  0x85   : > { %315 = vadd.xlane.f32.xlu0 %v314_v21 }
  0x88   : > { %321 = vadd.xlane.f32.xlu1 %v320_v22 }
  0x89   : > { %318 = vadd.xlane.f32.xlu0 %v317_v23 }
 0x109   : > { %v299_v25 = vpop.xlane.xlu1 %298 }
 0x10a   : > { %v293_v26 = vpop.xlane.xlu0 %292 }
 0x10d   : > { %v313_v27 = vpop.xlane.xlu1 %312 }
 0x10e   : > { %v296_v28 = vpop.xlane.xlu0 %295 }
 0x10f   : > { %v324_v29 = vadd.f32 %v296_v28, %v293_v26 }
 0x111   : > { %v302_v30 = vpop.xlane.xlu1 %301  ;;  %v325_v31 = vadd.f32 %v324_v29, %v299_v25 }
 0x112   : > { %v316_v33 = vpop.xlane.xlu0 %315 }
 0x113   : > { %v326_v34 = vadd.f32 %v325_v31, %v302_v30  ;;  %v331_v36 = vadd.f32 %v316_v33, %v313_v27 }
 0x115   : > { %v327_v35 = vadd.f32 %v326_v34, %v323_v32  ;;  %v322_v38 = vpop.xlane.xlu1 %321 }
 0x116   : > { %v319_v37 = vpop.xlane.xlu0 %318 }
 0x117   : > { %329 = vst.msk [vmem:[#allocation2] sm:$0xff] %vm280_vm0, %v327_v35  ;;  %v332_v39 = vadd.f32 %v331_v36, %v319_v37 }
 0x119   : > { %v333_v41 = vadd.f32 %v332_v39, %v322_v38 }
 0x11b   : > { %v334_v42 = vadd.f32 %v333_v41, %v330_v40 }
 0x11d   : > { %335 = vst.msk [vmem:[#allocation3] sm:$0xff] %vm280_vm0, %v334_v42 }
 0x11e   : > { %v339_v43 = vld [vmem:[#allocation2] sm:$0xff] }
 0x11f   : > { %v340_v44 = vmul.f32 0.0009765625, %v339_v43 }
 0x121   : > { %v343_v46 = vmul.f32 %v340_v44, %v340_v44 }
 0x124   : > { %v341_v45 = vld [vmem:[#allocation3] sm:$0xff] }
 0x125   : > { %v342_v47 = vmul.f32 0.0009765625, %v341_v45 }
 0x127   : > { %v344_v48 = vsub.f32 %v342_v47, %v343_v46 }
 0x129   : > { %v345_v49 = vmax.f32 %v344_v48, 0.0 }
 0x12b   : > { %v346_v50 = vadd.f32 1e-05, %v345_v49 }
 0x12d   : > { %674 = vrsqrt.f32 %v346_v50 }
 0x137   : > { %v675_v52 = vpop.eup %674 }
 0x138   : > { %v349_v53 = vmul.f32 %v675_v52, %v348_v51 }
 0x13a   : > { %350 = vst.msk [vmem:[#allocation4] sm:$0xff] %vm280_vm0, %v349_v53  ;;  %v352_v55 = vmul.f32 %v349_v53, %v340_v44 }
 0x13c   : > { %v353_v56 = vsub.f32 %v351_v54, %v352_v55 }
 0x13e   : > { %354 = vst.msk [vmem:[#allocation5] sm:$0xff] %vm280_vm0, %v353_v56 }
 0x13f PF: > { %p561_p11 = scmp.ne.s32.totalorder %s849_s15, 1 }
 0x140   : > { %v873_v58 = vmov (!%p561_p11), 0   ;;  %v359_v60 = vld [vmem:[%s1101_s1] sm:$0xff] (!%p561_p11)  ;;  %v360_v61 = vld [vmem:[%s1101_s1 + $0x8] sm:$0xff] (!%p561_p11)  ;;  %v361_v63 = vld [vmem:[%s1101_s1 + $0x10] sm:$0xff] (!%p561_p11) }
 0x141   : > { %358 = sbr.rel (%p561_p11) target bundleno = 460 (0x1cc), region = 60  ;;  %v367_v57 = vld [vmem:[#allocation4] sm:$0xff] (!%p561_p11)  ;;  %676 = vset.pattern.permute.xlu0 (!%p561_p11), %v873_v58  ;;  %v362_v0 = vld [vmem:[%s1101_s1 + $0x18] sm:$0xff] (!%p561_p11)  ;;  %v363_v1 = vld [vmem:[%s1101_s1 + $0x20] sm:$0xff] (!%p561_p11) }
 0x142   : > { %370 = vperm.xlu0 (!%p561_p11), %676, %v367_v57   ;;  %v364_v2 = vld [vmem:[%s1101_s1 + $0x28] sm:$0xff] (!%p561_p11)  ;;  %v365_v3 = vld [vmem:[%s1101_s1 + $0x30] sm:$0xff] (!%p561_p11)  ;;  %v366_v4 = vld [vmem:[%s1101_s1 + $0x38] sm:$0xff] (!%p561_p11) }
 0x145   : > { %v381_v59 = vld [vmem:[#allocation5] sm:$0xff] (!%p561_p11) }
 0x146   : > { %384 = vperm.xlu0 (!%p561_p11), %676, %v381_v59  }
 0x1c1   : > { %v371_v62 = vpop.permute.xlu0 %370 }
 0x1c2   : > { %v373_v5 = vmul.f32 %v371_v62, %v359_v60  ;;  %v374_v6 = vmul.f32 %v371_v62, %v360_v61  ;;  %v375_v7 = vmul.f32 %v371_v62, %v361_v63  ;;  %v376_v8 = vmul.f32 %v371_v62, %v362_v0 }
 0x1c3   : > { %v377_v10 = vmul.f32 %v371_v62, %v363_v1  ;;  %v378_v11 = vmul.f32 %v371_v62, %v364_v2  ;;  %v379_v12 = vmul.f32 %v371_v62, %v365_v3  ;;  %v380_v13 = vmul.f32 %v371_v62, %v366_v4 }
 0x1c5   : > { %v385_v9 = vpop.permute.xlu0 %384 }
 0x1c6   : > { %v387_v14 = vadd.f32 %v385_v9, %v373_v5  ;;  %v388_v15 = vadd.f32 %v385_v9, %v374_v6  ;;  %v389_v16 = vadd.f32 %v385_v9, %v375_v7  ;;  %v390_v17 = vadd.f32 %v385_v9, %v376_v8 }
 0x1c7   : > { %v391_v18 = vadd.f32 %v385_v9, %v377_v10  ;;  %v392_v19 = vadd.f32 %v385_v9, %v378_v11  ;;  %v393_v20 = vadd.f32 %v385_v9, %v379_v12  ;;  %v394_v21 = vadd.f32 %v385_v9, %v380_v13 }
 0x1c8   : > { %395 = vst [vmem:[%s1111_s27] sm:$0xff] %v387_v14  ;;  %396 = vst [vmem:[%s1111_s27 + $0x8] sm:$0xff] %v388_v15 }
 0x1c9   : > { %397 = vst [vmem:[%s1111_s27 + $0x10] sm:$0xff] %v389_v16  ;;  %398 = vst [vmem:[%s1111_s27 + $0x18] sm:$0xff] %v390_v17 }
 0x1ca   : > { %399 = vst [vmem:[%s1111_s27 + $0x20] sm:$0xff] %v391_v18  ;;  %400 = vst [vmem:[%s1111_s27 + $0x28] sm:$0xff] %v392_v19 }
 0x1cb   : > { %401 = vst [vmem:[%s1111_s27 + $0x30] sm:$0xff] %v393_v20  ;;  %402 = vst [vmem:[%s1111_s27 + $0x38] sm:$0xff] %v394_v21 }
 0x1cc PF: > { %s568_s15 = sshll.u32 %s853_s16, 10  ;;  %s423_s20 = sshll.u32 %s1111_s27, 4  ;;  %s1152_s20 = int_to_ptr.vmem [resolvable:$true] %s423_s20 }
 0x1cd   : > { %s1149_s30 = scalar_lea.hbm %s1209_s3, %s568_s15  ;;  %s404_s21 = scalar_lea.sflag [#allocation8], %s1097_s8 }
 0x1ce   : > { %s763_s28 = scalar_lea.vmem %s1152_s20, 1024  ;;  %p1232_p0 = scmp.ne.s32.totalorder %s1220_s25, 0 }
 0x1cf   : > { %p764_p13 = scmp.ne.s32.totalorder %s1152_s20, %s763_s28  ;;  %s874_s10 = smov [#allocation12]  }
 0x1d0   : > { %s767_s29 = sshll.u32 %s874_s10, 4  ;;  %s768_s29 = int_to_ptr.vmem [resolvable:$false] %s767_s29 }
 0x1d1   : > { %p765_p5 = pnand %p764_p13, %p1232_p0  ;;  %s769_s16 = scalar_lea.vmem %s768_s29, 2048 }
 0x1d2   : > { %p770_p3 = scmp.lt.s32.totalorder %s1152_s20, %s768_s29  ;;  %p771_p12 = scmp.lt.s32.totalorder %s769_s16, %s763_s28 }
 0x1d3   : > { %p766_p9 = pneg %p765_p5 }
 0x1d4   : > { %p772_p4 = por %p771_p12, %p770_p3 }
 0x1d6   : > { %p773_p6 = pnand %p772_p4, %p766_p9 }
 0x1d8   : > { %776 = shalt.err (!%p773_p6)
}
 0x1d9   : > { %s777_s6 = scalar_lea.hbm %s1149_s30, 1024  ;;  %s781_s9 = scalar_lea.hbm %s1209_s3, 2048 }
 0x1da   : > { %p778_p10 = scmp.ne.s32.totalorder %s1149_s30, %s777_s6  ;;  %p782_p2 = scmp.lt.u32.totalorder %s1149_s30, %s1209_s3 }
 0x1db   : > { %p783_p7 = scmp.lt.u32.totalorder %s781_s9, %s777_s6  ;;  %p785_p13 = scmp.lt.u32.totalorder %s777_s6, %s1149_s30 }
 0x1dc   : > { %p779_p8 = pnand %p778_p10, %p1232_p0 }
 0x1dd   : > { %p784_p11 = por %p783_p7, %p782_p2 }
 0x1de   : > { %p780_p1 = pneg %p779_p8 }
 0x1df   : > { %p786_p5 = por %p785_p13, %p784_p11 }
 0x1e1   : > { %p787_p9 = pnand %p786_p5, %p780_p1 }
 0x1e3   : > { %790 = shalt.err (!%p787_p9)
}
 0x1e4   : > { %s875_s15 = smov 256   ;;  %s876_s22 = smov 16  }
 0x1e5   : > { %579 = dma.vmem_to_hbm [thread:$0]  (%p1232_p0), %s1152_s20, 1024, %s1149_s30, %s404_s21, %s875_s15, %s875_s15, %s876_s22  }
 0x1e6 PF: > { %p601_p3 = scmp.ge.s32.totalorder %s865_s19, 2  ;;  %s438_s24 = sand.u32 1, %s837_s12  }
 0x1e7   : > { %p1233_p12 = scmp.ne.s32.totalorder %s1221_s26, 0  ;;  %s439_s28 = scalar_lea.sflag [#allocation8], %s438_s24 }
 0x1e9   : > { %p593_p4 = pnand %p601_p3, %p1233_p12 }
 0x1eb   : > { %832 = dma.done.wait (!%p593_p4), %s439_s28, 1024  }
 0x1ec   : > { %834 = vsyncadd (!%p593_p4), %s439_s28, 4294966272  ;;  %s20_s19 = sadd.s32 1, %s865_s19   ;;  %s1234_s12 = smov %s841_s13 }
 0x1ed   : > { %p17_p6 = scmp.ge.s32.totalorder %s20_s19, 6   ;;  %s1235_s13 = smov %s845_s14 }
 0x1ee   : > { %s1236_s14 = smov %s1092_s5  ;;  %s1237_s15 = smov %s857_s17 }
 0x1ef   : > { %s1238_s16 = smov %s861_s18  ;;  %s1239_s17 = smov %s1242_s4 }
 0x1f0   : > { %s1240_s18 = smov %s1246_s7  ;;  %19 = sbr.rel (!%p17_p6) target bundleno = 10 (0xa), region = 103 }
 0x1f7   :  { %444 = vsyncpa [#allocation7], 1 }
 0x1f8   :  { %446 = vsyncpa [#allocation7 + $0x1], 1 }
 0x1f9   :  { %447 = vsyncpa [#allocation10], 1 }
 0x1fa   :  { %448 = vsyncpa [#allocation8], 1 }
 0x1fb   :  { %450 = vsyncpa [#allocation8 + $0x1], 1 }

</bundles_post_ra>
